<compile_context>
chip_gen: v7x
topology: tpu7x:2x2x1
jax: 0.10.0
libtpu: 0.0.40
codegen_flags: <defaults>
</compile_context>

<pallas_src>
import jax
import jax.numpy as jnp
from jax.experimental import pallas as pl
from jax.experimental.pallas import tpu as pltpu


def mlp_kernel(xT_ref, w1_ref, b1_ref, w2_ref, b2_ref, w3_ref, b3_ref, oT_ref):
    # Batch-on-lanes layout: every operand is [features, Bt] (lane-dense).
    xT = xT_ref[...]                                          # [1, Bt]

    # Layer 1 (in_features=1): a K=1 matmul would waste the MXU, so compute it
    # as a VPU broadcast multiply instead.
    h1 = jnp.maximum(w1_ref[...] * xT + b1_ref[...], 0.0)     # [40, Bt]

    # Layer 2 (40 -> 10): lane-dense MXU matmul with f32 accumulation.
    h2 = jnp.dot(w2_ref[...], h1, preferred_element_type=jnp.float32)
    h2 = jax.nn.sigmoid(h2 + b2_ref[...])                     # [10, Bt]

    # Layer 3 (out_features=1): VPU multiply + XLU cross-sublane reduction
    # (padded lanes of a partial last block never mix across lanes here).
    out = jnp.sum(w3_ref[...] * h2, axis=0, keepdims=True) + b3_ref[...]
    oT_ref[...] = out.astype(oT_ref.dtype)                    # [1, Bt]


def _round_up(n, m):
    return ((n + m - 1) // m) * m


def _cdiv(a, b):
    return -(-a // b)


def _choose_block(B, block_b):
    if block_b <= 0 or block_b % 128 != 0:
        raise ValueError("block_b must be a positive multiple of 128")
    bb = min(block_b, _round_up(B, 128))
    # Keep >= 2 grid steps whenever the batch allows it so the "parallel"
    # grid axis can shard across v7x's 2 TensorCores (harmless on 1-TC chips).
    if B > 128 and _cdiv(B, bb) < 2:
        bb = _round_up(_cdiv(B, 2), 128)
    return bb


def _vmem_limit_bytes():
    """Generation-aware VMEM cap: ~3/4 of physical, clipped to [32, 96] MiB.

    v7x (64 MiB physical) -> 48 MiB; v5e/v6e (128 MiB) -> 96 MiB.
    """
    try:
        cap = int(pltpu.get_tpu_info().vmem_capacity_bytes)
    except Exception:
        cap = 64 * 1024 * 1024          # conservative (v7x-sized) fallback
    return int(min(max(cap * 3 // 4, 32 * 1024 * 1024), 96 * 1024 * 1024))


def net_forward(x, params, *, block_b=32768):
    """x: [B, 1] float32 -> [B, 1].  Same math as the PyTorch Net."""
    w1, b1, w2, b2, w3, b3 = params
    B = x.shape[0]

    bb = _choose_block(B, block_b)
    grid = (_cdiv(B, bb),)

    # Batch on lanes: [B, 1] -> [1, B] (contiguous, metadata-only reshape).
    # No wrapper-side jnp.pad: a partial last block is handled by Pallas —
    # the input block is padded with don't-care lanes and the out-of-bounds
    # part of the output store is masked, so no garbage reaches user memory.
    xT = x.reshape(1, B)

    const2d = lambda a: pl.BlockSpec(a.shape, lambda i: (0, 0))  # VMEM-resident

    cost = pl.CostEstimate(
        flops=940 * B,                     # ~(80 + 810 + 50) flops per element
        transcendentals=10 * B,            # sigmoid on the [10, B] hidden
        bytes_accessed=8 * B + 4 * (40 + 40 + 400 + 10 + 10 + 1),
    )

    outT = pl.pallas_call(
        mlp_kernel,
        out_shape=jax.ShapeDtypeStruct((1, B), x.dtype),
        grid=grid,
        in_specs=[
            pl.BlockSpec((1, bb), lambda i: (0, i)),   # xT, tiled over batch
            const2d(w1), const2d(b1),
            const2d(w2), const2d(b2),
            const2d(w3), const2d(b3),
        ],
        out_specs=pl.BlockSpec((1, bb), lambda i: (0, i)),
        compiler_params=pltpu.CompilerParams(
            dimension_semantics=("parallel",),          # megacore sharding
            vmem_limit_bytes=_vmem_limit_bytes(),
        ),
        cost_estimate=cost,
    )(xT, w1, b1, w2, b2, w3, b3)

    # Restore the [B, 1] caller layout (free reshape, no slice needed).
    return outT.reshape(B, 1)


def init_params(key):
    """Deterministic init mimicking PyTorch's default U(-1/sqrt(fan_in), +).

    Parameters are stored directly in the kernel's transposed layout:
      w1 [40, 1], b1 [40, 1], w2 [10, 40], b2 [10, 1], w3 [10, 1], b3 [1, 1]
    """
    def linear(key, fan_in, fan_out):
        kw, kb = jax.random.split(key)
        bound = 1.0 / jnp.sqrt(jnp.float32(fan_in))
        w = jax.random.uniform(kw, (fan_out, fan_in), jnp.float32, -bound, bound)
        b = jax.random.uniform(kb, (fan_out, 1), jnp.float32, -bound, bound)
        return w, b

    k1, k2, k3 = jax.random.split(key, 3)
    w1, b1 = linear(k1, 1, 40)          # [40, 1], [40, 1]
    w2, b2 = linear(k2, 40, 10)         # [10, 40], [10, 1]
    w3t, b3 = linear(k3, 10, 1)         # [1, 10], [1, 1]
    w3 = w3t.T                          # kernel wants the [10, 1] column
    return (w1, b1, w2, b2, w3, b3)


if __name__ == "__main__":
    key = jax.random.PRNGKey(0)
    pkey, xkey = jax.random.split(key)

    params = init_params(pkey)

    # Small demo batch: with the default block_b the chooser clamps the tile
    # to 256 lanes and produces a 2-step grid with a partial last block, which
    # exercises the no-pad edge-block path and the multi-step pipeline.
    B = 300
    x = jax.random.normal(xkey, (B, 1), jnp.float32)

    out = net_forward(x, params)
    jax.block_until_ready(out)

    # Sanity check against a plain-JAX reference with PyTorch semantics
    # (y = x @ W.T + b, weights stored [out, in]).
    w1, b1, w2, b2, w3, b3 = params
    ref = jnp.maximum(x @ w1.T + b1.T, 0.0)
    ref = jax.nn.sigmoid(ref @ w2.T + b2.T)
    ref = ref @ w3 + b3.T

    assert out.shape == (B, 1)
    assert jnp.allclose(out, ref, atol=1e-5, rtol=1e-5)

    print("KERNEL_OK")
</pallas_src>

<mosaic_0001>
module attributes {stable_mosaic.version = 11 : i64} {
  func.func @mlp_kernel(%arg0: i32, %arg1: memref<1x256xf32, #tpu.memory_space<vmem>>, %arg2: memref<40x1xf32, #tpu.memory_space<vmem>>, %arg3: memref<40x1xf32, #tpu.memory_space<vmem>>, %arg4: memref<10x40xf32, #tpu.memory_space<vmem>>, %arg5: memref<10x1xf32, #tpu.memory_space<vmem>>, %arg6: memref<10x1xf32, #tpu.memory_space<vmem>>, %arg7: memref<1x1xf32, #tpu.memory_space<vmem>>, %arg8: memref<1x256xf32, #tpu.memory_space<vmem>>) attributes {dimension_semantics = [#tpu.dimension_semantics<parallel>], iteration_bounds = array<i64: 2>, scalar_prefetch = 0 : i64, scratch_operands = 0 : i64, tpu.core_type = #tpu.core_type<tc>, window_params = [{transform_indices = @transform_0, window_bounds = array<i64: 1, 256>}, {pipeline_mode = #tpu.pipeline_mode<synchronous>, transform_indices = @transform_1, window_bounds = array<i64: 40, 1>}, {pipeline_mode = #tpu.pipeline_mode<synchronous>, transform_indices = @transform_2, window_bounds = array<i64: 40, 1>}, {pipeline_mode = #tpu.pipeline_mode<synchronous>, transform_indices = @transform_3, window_bounds = array<i64: 10, 40>}, {pipeline_mode = #tpu.pipeline_mode<synchronous>, transform_indices = @transform_4, window_bounds = array<i64: 10, 1>}, {pipeline_mode = #tpu.pipeline_mode<synchronous>, transform_indices = @transform_5, window_bounds = array<i64: 10, 1>}, {pipeline_mode = #tpu.pipeline_mode<synchronous>, transform_indices = @transform_6, window_bounds = array<i64: 1, 1>}, {transform_indices = @transform_7, window_bounds = array<i64: 1, 256>}]} {
    %c0 = arith.constant 0 : index
    %c0_0 = arith.constant 0 : index
    %0 = vector.load %arg1[%c0, %c0_0] : memref<1x256xf32, #tpu.memory_space<vmem>>, vector<1x256xf32>
    %c0_1 = arith.constant 0 : index
    %c0_2 = arith.constant 0 : index
    %1 = vector.load %arg2[%c0_1, %c0_2] : memref<40x1xf32, #tpu.memory_space<vmem>>, vector<40x1xf32>
    %2 = vector.broadcast %1 : vector<40x1xf32> to vector<40x256xf32>
    %3 = vector.broadcast %0 : vector<1x256xf32> to vector<40x256xf32>
    %4 = arith.mulf %2, %3 : vector<40x256xf32>
    %c0_3 = arith.constant 0 : index
    %c0_4 = arith.constant 0 : index
    %5 = vector.load %arg3[%c0_3, %c0_4] : memref<40x1xf32, #tpu.memory_space<vmem>>, vector<40x1xf32>
    %6 = vector.broadcast %5 : vector<40x1xf32> to vector<40x256xf32>
    %7 = arith.addf %4, %6 : vector<40x256xf32>
    %cst = arith.constant 0.000000e+00 : f32
    %8 = vector.broadcast %cst : f32 to vector<40x256xf32>
    %9 = arith.maximumf %7, %8 : vector<40x256xf32>
    %c0_5 = arith.constant 0 : index
    %c0_6 = arith.constant 0 : index
    %10 = vector.load %arg4[%c0_5, %c0_6] : memref<10x40xf32, #tpu.memory_space<vmem>>, vector<10x40xf32>
    %cst_7 = arith.constant dense<0.000000e+00> : vector<10x256xf32>
    %11 = tpu.matmul %10, %9, %cst_7 {dimension_numbers = #tpu.dot_dimension_numbers<[1], [0], [0], [1], [0, 0, 1, 1], [], []>} : vector<10x40xf32>, vector<40x256xf32>, vector<10x256xf32> -> vector<10x256xf32>
    %c0_8 = arith.constant 0 : index
    %c0_9 = arith.constant 0 : index
    %12 = vector.load %arg5[%c0_8, %c0_9] : memref<10x1xf32, #tpu.memory_space<vmem>>, vector<10x1xf32>
    %13 = vector.broadcast %12 : vector<10x1xf32> to vector<10x256xf32>
    %14 = arith.addf %11, %13 : vector<10x256xf32>
    %15 = arith.negf %14 : vector<10x256xf32>
    %16 = math.exp %15 : vector<10x256xf32>
    %cst_10 = arith.constant 1.000000e+00 : f32
    %17 = vector.broadcast %cst_10 : f32 to vector<10x256xf32>
    %18 = arith.addf %17, %16 : vector<10x256xf32>
    %19 = arith.divf %17, %18 : vector<10x256xf32>
    %c0_11 = arith.constant 0 : index
    %c0_12 = arith.constant 0 : index
    %20 = vector.load %arg6[%c0_11, %c0_12] : memref<10x1xf32, #tpu.memory_space<vmem>>, vector<10x1xf32>
    %21 = vector.broadcast %20 : vector<10x1xf32> to vector<10x256xf32>
    %22 = arith.mulf %21, %19 : vector<10x256xf32>
    %cst_13 = arith.constant dense<0.000000e+00> : vector<256xf32>
    %23 = vector.multi_reduction <add>, %22, %cst_13 [0] : vector<10x256xf32> to vector<256xf32>
    %24 = vector.shape_cast %23 : vector<256xf32> to vector<1x256xf32>
    %c0_14 = arith.constant 0 : index
    %c0_15 = arith.constant 0 : index
    %25 = vector.load %arg7[%c0_14, %c0_15] : memref<1x1xf32, #tpu.memory_space<vmem>>, vector<1x1xf32>
    %26 = vector.broadcast %25 : vector<1x1xf32> to vector<1x256xf32>
    %27 = arith.addf %24, %26 : vector<1x256xf32>
    %c0_16 = arith.constant 0 : index
    %c0_17 = arith.constant 0 : index
    %28 = vector.load %arg8[%c0_16, %c0_17] : memref<1x256xf32, #tpu.memory_space<vmem>>, vector<1x256xf32>
    tpu.vector_store %arg8[%c0_16, %c0_17], %27 {strides = array<i32>} : memref<1x256xf32, #tpu.memory_space<vmem>>, vector<1x256xf32>,
    return
  }
  func.func @transform_0(%arg0: i32) -> (i32, i32) {
    %c0_i32 = arith.constant 0 : i32
    %c0_i32_0 = arith.constant 0 : i32
    return %c0_i32, %arg0 : i32, i32
  }
  func.func @transform_1(%arg0: i32) -> (i32, i32) {
    %c0_i32 = arith.constant 0 : i32
    %c0_i32_0 = arith.constant 0 : i32
    %c0_i32_1 = arith.constant 0 : i32
    return %c0_i32, %c0_i32_0 : i32, i32
  }
  func.func @transform_2(%arg0: i32) -> (i32, i32) {
    %c0_i32 = arith.constant 0 : i32
    %c0_i32_0 = arith.constant 0 : i32
    %c0_i32_1 = arith.constant 0 : i32
    return %c0_i32, %c0_i32_0 : i32, i32
  }
  func.func @transform_3(%arg0: i32) -> (i32, i32) {
    %c0_i32 = arith.constant 0 : i32
    %c0_i32_0 = arith.constant 0 : i32
    %c0_i32_1 = arith.constant 0 : i32
    return %c0_i32, %c0_i32_0 : i32, i32
  }
  func.func @transform_4(%arg0: i32) -> (i32, i32) {
    %c0_i32 = arith.constant 0 : i32
    %c0_i32_0 = arith.constant 0 : i32
    %c0_i32_1 = arith.constant 0 : i32
    return %c0_i32, %c0_i32_0 : i32, i32
  }
  func.func @transform_5(%arg0: i32) -> (i32, i32) {
    %c0_i32 = arith.constant 0 : i32
    %c0_i32_0 = arith.constant 0 : i32
    %c0_i32_1 = arith.constant 0 : i32
    return %c0_i32, %c0_i32_0 : i32, i32
  }
  func.func @transform_6(%arg0: i32) -> (i32, i32) {
    %c0_i32 = arith.constant 0 : i32
    %c0_i32_0 = arith.constant 0 : i32
    %c0_i32_1 = arith.constant 0 : i32
    return %c0_i32, %c0_i32_0 : i32, i32
  }
  func.func @transform_7(%arg0: i32) -> (i32, i32) {
    %c0_i32 = arith.constant 0 : i32
    %c0_i32_0 = arith.constant 0 : i32
    return %c0_i32, %arg0 : i32, i32
  }
}

</mosaic_0001>

<bundles_post_ra>
// kernel: tpu_custom_call.1
= control target key start
LH: loop header
LB: loop body
LE: loop exit
PB: predicated region body
PF: predicated region fallthrough
CT: control target
= control target key end

     0   :  { %s1049_s0 = inlined_call_operand.vmem [shape: f32[1,300], index: 0, kind: input, shape index: {}]   ;;  %s1050_s1 = inlined_call_operand.vmem [shape: f32[40,1], index: 1, kind: input, shape index: {}]   ;;  %s1051_s2 = inlined_call_operand.vmem [shape: f32[40,1], index: 2, kind: input, shape index: {}]   ;;  %s1052_s3 = inlined_call_operand.vmem [shape: f32[10,40], index: 3, kind: input, shape index: {}]   ;;  %s1053_s4 = inlined_call_operand.vmem [shape: f32[10,1], index: 4, kind: input, shape index: {}]   ;;  %s1054_s5 = inlined_call_operand.vmem [shape: f32[10,1], index: 5, kind: input, shape index: {}]   ;;  %s1055_s6 = inlined_call_operand.<no memory space> [shape: f32[1,1], index: 6, kind: input, shape index: {}]   ;;  %s1056_s7 = inlined_call_operand.hbm [shape: f32[1,300], index: 7, kind: output, shape index: {}]  }
   0x1   :  { %v12_v0 = vstv %s1055_s6 }
   0x2   :  { %13 = vst [vmem:[#allocation2] sm:$0x1] %v12_v0 }
   0x3   :  { %14 = vsyncpa [#allocation4], 0 }
   0x4   :  { %16 = vsyncpa [#allocation4 + $0x1], 0  ;;  %s875_s26 = smov 0   ;;  %s877_s27 = smov 0  }
   0x5   :  { %s879_s28 = smov 0   ;;  %s881_s29 = smov 0  }
   0x6 LB: > { %s896_s6 = sadd.s32 4294967295, %s826_s29   ;;  %s671_s30 = sadd.s32 4294967294, %s826_s29   ;;  %s826_s29 = sphi %s881_s29, %s1062_s29   ;;  %s822_s28 = sphi %s879_s28, %s1061_s28   ;;  %s818_s27 = sphi %s877_s27, %s1060_s27   ;;  %s814_s26 = sphi %s875_s26, %s1059_s26  }
   0x7   : > { %s900_s8 = sadd.s32 1, %s826_s29   ;;  %s181_s9 = sadd.s32 1, %s822_s28 }
   0x8   : > { %s178_s10 = ssub.s32 %s826_s29, %s900_s8  ;;  %p191_p0 = scmp.ne.s32.totalorder %s822_s28, %s818_s27 }
   0x9   : > { %p179_p1 = scmp.eq.s32.totalorder %s178_s10, 0  ;;  %p192_p2 = scmp.eq.s32.totalorder %s896_s6, 1 }
   0xa   : > { %p197_p3 = scmp.ne.s32.totalorder %s818_s27, %s814_s26  ;;  %p198_p4 = scmp.eq.s32.totalorder %s671_s30, 1 }
   0xb   : > { %s911_s11 = scalar_select %p179_p1, %s822_s28, %s181_s9  }
   0xc   : > { %p913_p5 = por %p192_p2, %p191_p0  ;;  %p917_p6 = por %p198_p4, %p197_p3 }
   0xd   : > { %p674_p7 = scmp.ge.s32.totalorder %s826_s29, 1  ;;  %p250_p8 = scmp.lt.s32.totalorder %s826_s29, 3 }
   0xf   : > { %p251_p9 = pnand %p674_p7, %p250_p8 }
  0x10   : > { %v355_v1 = vld [vmem:[%s1051_s2] sm:$0xff] (!%p251_p9)  ;;  %v828_v3 = vmov (!%p251_p9), 0   ;;  %v356_v4 = vld [vmem:[%s1051_s2 + $0x8] sm:$0xff] (!%p251_p9)  ;;  %v307_v6 = vld [vmem:[%s1050_s1 + $0x18] sm:$0xff] (!%p251_p9)  ;;  %v829_v16 = vmov (!%p251_p9), 0.0   ;;  %s966_s9 = sshll.u32 (!%p251_p9), %s896_s6, 1  ;;  %v335_v18 = vlaneseq (!%p251_p9) }
  0x11   : > { %254 = sbr.rel (%p251_p9) target bundleno = 466 (0x1d2), region = 48  ;;  %v304_v2 = vld [vmem:[%s1050_s1] sm:$0xff] (!%p251_p9)  ;;  %747 = vset.pattern.permute.xlu1 (!%p251_p9), %v828_v3  ;;  %746 = vset.pattern.permute.xlu0 (!%p251_p9), %v828_v3  ;;  %v305_v5 = vld [vmem:[%s1050_s1 + $0x8] sm:$0xff] (!%p251_p9)  ;;  %v306_v7 = vld [vmem:[%s1050_s1 + $0x10] sm:$0xff] (!%p251_p9)  ;;  %p290_p10 = scmp.lt.s32.totalorder (!%p251_p9), %s966_s9, 2  ;;  %vm419_vm0 = vcmask (!%p251_p9), 326656  }
  0x12   : > { %362 = vperm.xlu1 (!%p251_p9), %747, %v355_v1   ;;  %311 = vperm.xlu0 (!%p251_p9), %746, %v304_v2   ;;  %v358_v8 = vld [vmem:[%s1051_s2 + $0x18] sm:$0xff] (!%p251_p9)  ;;  %v357_v9 = vld [vmem:[%s1051_s2 + $0x10] sm:$0xff] (!%p251_p9)  ;;  %v359_v10 = vld [vmem:[%s1051_s2 + $0x20] sm:$0xff] (!%p251_p9)  ;;  %v971_v19 = vshrl.u32 (!%p251_p9), %v335_v18, 7  ;;  %s282_s21 = sand.u32 (!%p251_p9), 1, %s818_s27   ;;  %vm543_vm1 = vcmask (!%p251_p9), 1041408  }
  0x13   : > { %v308_v11 = vld [vmem:[%s1050_s1 + $0x20] sm:$0xff] (!%p251_p9)  ;;  %v408_v13 = vld [vmem:[%s1053_s4 + $0x8] sm:$0x3] (!%p251_p9)  ;;  %490 = vmatprep.mubr.f32.mxu0 (!%p251_p9), %v829_v16  ;;  %496 = vmatprep.mubr.f32.mxu1 (!%p251_p9), %v829_v16  ;;  %s675_s22 = sshll.u32 (!%p251_p9), %s282_s21, 1  ;;  %vm592_vm2 = vcmp.lt.s32.totalorder (!%p251_p9), %v335_v18, 256  ;;  %s995_s24 = scalar_lea.sflag (!%p251_p9), [#allocation4], %s282_s21 }
  0x14   : > { %v407_v12 = vld [vmem:[%s1053_s4] sm:$0xff] (!%p251_p9)  ;;  %v528_v15 = vld [vmem:[%s1054_s5 + $0x8] sm:$0x3] (!%p251_p9)  ;;  %v337_v20 = vsub.s32 (!%p251_p9), 0, %v971_v19  ;;  %v341_v21 = vsub.s32 (!%p251_p9), 1, %v971_v19  ;;  %s284_s23 = scalar_lea.vmem (!%p251_p9), [#allocation3], %s675_s22 }
  0x15   : > { %v527_v14 = vld [vmem:[%s1054_s5] sm:$0xff] (!%p251_p9) }
  0x16   : > { %367 = vperm.xlu1 (!%p251_p9), %747, %v356_v4   ;;  %316 = vperm.xlu0 (!%p251_p9), %746, %v305_v5   ;;  %v560_v17 = vld [vmem:[#allocation2] sm:$0x1] (!%p251_p9) }
  0x17   : > { %v405_v5 = vld [vmem:[%s1052_s3] sm:$0xff] (!%p251_p9) }
  0x18   : > { %s291_s10 = scalar_select %p290_p10, %s966_s9, 2 }
  0x19   : > { %s604_s25 = ssub.s32 (%p913_p5), 3, %s966_s9 }
  0x1a   : > { %326 = vperm.xlu1 %747, %v307_v6   ;;  %321 = vperm.xlu0 %746, %v306_v7   ;;  %s292_s16 = scalar_lea.vmem %s1049_s0, %s291_s10  ;;  %v406_v6 = vld [vmem:[%s1052_s3 + $0x8] sm:$0x3]  ;;  %p605_p11 = scmp.lt.s32.totalorder (%p913_p5), %s604_s25, 2 }
  0x1b   : > { %v303_v22 = vld [vmem:[%s292_s16] sm:$0x3] }
  0x1c   : > { %v338_v23 = vrot.slane %v303_v22, %v337_v20  ;;  %v342_v24 = vrot.slane %v303_v22, %v341_v21 }
  0x1e   : > { %377 = vperm.xlu1 %747, %v358_v8   ;;  %372 = vperm.xlu0 %746, %v357_v9  }
  0x22   : > { %382 = vperm.xlu1 %747, %v359_v10   ;;  %331 = vperm.xlu0 %746, %v308_v11  }
  0x26   : > { %411 = vperm.xlu1 %747, %v407_v12   ;;  %416 = vperm.xlu0 %746, %v408_v13  }
  0x2a   : > { %531 = vperm.xlu1 %747, %v527_v14   ;;  %536 = vperm.xlu0 %746, %v528_v15  }
  0x2e   : > { %563 = vperm.xlu0 %746, %v560_v17  }
  0x91   : > { %v363_v25 = vpop.permute.xlu1 %362  ;;  %v312_v26 = vpop.permute.xlu0 %311 }
  0x92   : > { %v345_v27 = vmul.f32 %v338_v23, %v312_v26  ;;  %v346_v28 = vmul.f32 %v342_v24, %v312_v26 }
  0x94   : > { %v385_v33 = vadd.f32 %v363_v25, %v345_v27  ;;  %v386_v34 = vadd.f32 %v363_v25, %v346_v28 }
  0x95   : > { %v368_v29 = vpop.permute.xlu1 %367  ;;  %v317_v30 = vpop.permute.xlu0 %316 }
  0x96   : > { %v347_v31 = vmul.f32 %v338_v23, %v317_v30  ;;  %v348_v32 = vmul.f32 %v342_v24, %v317_v30  ;;  %v396_v39 = vmax.f32 %v386_v34, 0.0  ;;  %v395_v41 = vmax.f32 %v385_v33, 0.0 }
  0x98   : > { %v387_v35 = vadd.f32 %v368_v29, %v347_v31  ;;  %v388_v36 = vadd.f32 %v368_v29, %v348_v32 }
  0x99   : > { %v327_v37 = vpop.permute.xlu1 %326  ;;  %v322_v38 = vpop.permute.xlu0 %321 }
  0x9a   : > { %v398_v40 = vmax.f32 %v388_v36, 0.0  ;;  %v397_v42 = vmax.f32 %v387_v35, 0.0  ;;  %v351_v43 = vmul.f32 %v338_v23, %v327_v37  ;;  %v352_v44 = vmul.f32 %v342_v24, %v327_v37 }
  0x9b   : > { %v349_v45 = vmul.f32 %v338_v23, %v322_v38  ;;  %v350_v46 = vmul.f32 %v342_v24, %v322_v38 }
  0x9c   : > { %v691_v49 = vpack.c.bf16 %v398_v40, %v396_v39  ;;  %v693_v50 = vpack.c.bf16 %v397_v42, %v395_v41 }
  0x9d   : > { %v378_v47 = vpop.permute.xlu1 %377  ;;  %v373_v48 = vpop.permute.xlu0 %372 }
  0x9e   : > { %v391_v51 = vadd.f32 %v378_v47, %v351_v43  ;;  %v392_v52 = vadd.f32 %v378_v47, %v352_v44  ;;  %v389_v53 = vadd.f32 %v373_v48, %v349_v45  ;;  %v390_v54 = vadd.f32 %v373_v48, %v350_v46  ;;  %692 = vmatprep.subr.bf16.mxu0 %v691_v49 }
  0x9f   : > { %699 = vmatprep.subr.bf16.mxu1 %v691_v49  ;;  %694 = vmatpush1.bf16.msra.mxu0 %v693_v50 }
  0xa0   : > { %v401_v55 = vmax.f32 %v391_v51, 0.0  ;;  %v402_v56 = vmax.f32 %v392_v52, 0.0  ;;  %v399_v57 = vmax.f32 %v389_v53, 0.0  ;;  %v400_v58 = vmax.f32 %v390_v54, 0.0  ;;  %702 = vmatpush1.bf16.msra.mxu1 %v693_v50 }
  0xa1   : > { %v332_v59 = vpop.permute.xlu0 %331  ;;  %v383_v0 = vpop.permute.xlu1 %382  ;;  %v830_v51 = vmov 1966171168  }
  0xa2   : > { %v353_v60 = vmul.f32 %v338_v23, %v332_v59  ;;  %v354_v61 = vmul.f32 %v342_v24, %v332_v59  ;;  %v695_v62 = vpack.c.bf16 %v402_v56, %v400_v58  ;;  %v697_v63 = vpack.c.bf16 %v401_v55, %v399_v57 }
  0xa3   : > { %v576_v52 = vunpack.c.l.s4 %v830_v51 }
  0xa4   : > { %v393_v1 = vadd.f32 %v383_v0, %v353_v60  ;;  %v394_v2 = vadd.f32 %v383_v0, %v354_v61  ;;  %696 = vmatprep.subr.bf16.mxu0 %v695_v62  ;;  %700 = vmatprep.subr.bf16.mxu1 %v695_v62 }
  0xa5   : > { %698 = vmatpush1.bf16.msra.mxu0 %v697_v63  ;;  %703 = vmatpush1.bf16.msra.mxu1 %v697_v63  ;;  %v412_v7 = vpop.permute.xlu1 %411  ;;  %v417_v8 = vpop.permute.xlu0 %416  ;;  %v577_v58 = vunpack.c.0.s8 %v576_v52 }
  0xa6   : > { %v404_v3 = vmax.f32 %v394_v2, 0.0  ;;  %v403_v4 = vmax.f32 %v393_v1, 0.0 }
  0xa7   : > { %v580_v0 = vsub.s32 %v577_v58, %v971_v19 }
  0xa8   : > { %434 = vmatprep.subr.mxu0 %v404_v3  ;;  %701 = vmatprep.subr.mxu1 %v404_v3 }
  0xa9   : > { %435 = vmatpush1.msra.mxu0 %v403_v4  ;;  %704 = vmatpush1.msra.mxu1 %v403_v4  ;;  %v532_v33 = vpop.permute.xlu1 %531  ;;  %v537_v35 = vpop.permute.xlu0 %536 }
  0xaa   : > { %677 = vmatmul.mubr.msk.f32.vlgmr.msra.gmra.mrb[0].mxu0 %vm419_vm0, %v405_v5  ;;  %678 = vmatmul.mubr.msk.f32.vlgmr.msra.gmra.mrb[0].mxu1 %vm419_vm0, %v406_v6 }
  0xad   : > { %v564_v55 = vpop.permute.xlu0 %563 }
  0xae   : > { %v569_v59 = vrot.slane %v564_v55, %v337_v20 }
 0x17d   : > { %v492_v9 = vpop.f32.mrb[0].mxu0  ;;  %v498_v10 = vpop.f32.mrb[0].mxu1 }
 0x17e   : > { %v493_v11 = vadd.f32 %v492_v9, %v412_v7  ;;  %v499_v12 = vadd.f32 %v498_v10, %v417_v8  ;;  %v494_v13 = vpop.f32.mrb[1].mxu0  ;;  %v500_v14 = vpop.f32.mrb[1].mxu1 }
 0x17f   : > { %v495_v15 = vadd.f32 %v494_v13, %v412_v7  ;;  %v501_v16 = vadd.f32 %v500_v14, %v417_v8 }
 0x180   : > { %v679_v17 = vmul.f32 -1.442695, %v493_v11  ;;  %v681_v21 = vmul.f32 -1.442695, %v499_v12 }
 0x181   : > { %v680_v22 = vmul.f32 -1.442695, %v495_v15  ;;  %v682_v23 = vmul.f32 -1.442695, %v501_v16 }
 0x182   : > { %748 = vpow2.f32 %v679_v17 }
 0x183   : > { %750 = vpow2.f32 %v681_v21 }
 0x184   : > { %752 = vpow2.f32 %v680_v22 }
 0x185   : > { %754 = vpow2.f32 %v682_v23 }
 0x18c   : > { %v749_v24 = vpop.eup %748 }
 0x18d   : > { %v751_v25 = vpop.eup %750  ;;  %v515_v26 = vadd.f32 1.0, %v749_v24 }
 0x18e   : > { %v753_v27 = vpop.eup %752  ;;  %v517_v28 = vadd.f32 1.0, %v751_v25 }
 0x18f   : > { %v755_v29 = vpop.eup %754  ;;  %756 = vrcp.f32 %v515_v26  ;;  %v516_v30 = vadd.f32 1.0, %v753_v27 }
 0x190   : > { %758 = vrcp.f32 %v517_v28  ;;  %v518_v31 = vadd.f32 1.0, %v755_v29 }
 0x191   : > { %760 = vrcp.f32 %v516_v30 }
 0x192   : > { %762 = vrcp.f32 %v518_v31 }
 0x199   : > { %v757_v32 = vpop.eup %756 }
 0x19a   : > { %v759_v34 = vpop.eup %758  ;;  %v539_v36 = vmul.f32 %v757_v32, %v532_v33 }
 0x19b   : > { %v761_v37 = vpop.eup %760  ;;  %v541_v38 = vmul.f32 %v759_v34, %v537_v35 }
 0x19c   : > { %v763_v39 = vpop.eup %762  ;;  %v540_v40 = vmul.f32 %v761_v37, %v532_v33 }
 0x19d   : > { %v544_v41 = vsel %vm543_vm1, %v541_v38, 0.0  ;;  %v542_v42 = vmul.f32 %v763_v39, %v537_v35 }
 0x19e   : > { %v545_v43 = vadd.f32 %v544_v41, %v539_v36 }
 0x19f   : > { %v552_v44 = vsel %vm543_vm1, %v542_v42, 0.0 }
 0x1a0   : > { %v546_v45 = vrot.slane %v545_v43, 4  ;;  %v553_v46 = vadd.f32 %v552_v44, %v540_v40 }
 0x1a2   : > { %v547_v47 = vadd.f32 %v546_v45, %v545_v43  ;;  %v554_v48 = vrot.slane %v553_v46, 4 }
 0x1a4   : > { %v548_v49 = vrot.slane %v547_v47, 2  ;;  %v555_v50 = vadd.f32 %v554_v48, %v553_v46 }
 0x1a6   : > { %v549_v53 = vadd.f32 %v548_v49, %v547_v47  ;;  %v556_v54 = vrot.slane %v555_v50, 2 }
 0x1a8   : > { %v550_v56 = vrot.slane %v549_v53, 1  ;;  %v557_v57 = vadd.f32 %v556_v54, %v555_v50 }
 0x1aa   : > { %v551_v60 = vadd.f32 %v550_v56, %v549_v53  ;;  %v558_v61 = vrot.slane %v557_v57, 1 }
 0x1ac   : > { %v570_v62 = vadd.f32 %v569_v59, %v551_v60  ;;  %v559_v63 = vadd.f32 %v558_v61, %v557_v57 }
 0x1ae   : > { %v571_v1 = vadd.f32 %v569_v59, %v559_v63 }
 0x1b0   : > { %v574_v2 = vcombine.low %v570_v62, %v571_v1  ;;  %602 = sbr.rel (!%p913_p5) target bundleno = 466 (0x1d2), region = 52 }
 0x1b2   : > { %v581_v3 = vrot.slane %v574_v2, %v580_v0 }
 0x1b4   : > { %v588_v4 = vrot.slane %v581_v3, %v580_v0 }
 0x1b6   : > { %594 = vst.msk [vmem:[%s284_s23] sm:$0x3] %vm592_vm2, %v588_v4 }
 0x1b7   : > { %s1064_s25 = smov (!%p605_p11, %s604_s25), 2 }
 0x1b8   : > { %s1000_s30 = sshll.u32 %s1064_s25, 4 }
 0x1b9   : > { %s609_s10 = ssub.s32 32, %s1000_s30 }
 0x1ba   : > { %610 = vsyncadd %s995_s24, %s609_s10  ;;  %p686_p12 = scmp.ne.s32.totalorder %s1000_s30, 0  ;;  %s690_s14 = sshll.u32 %s896_s6, 5 }
 0x1bb   : > { %s1009_s12 = scalar_lea.hbm %s1056_s7, %s690_s14  ;;  %s615_s17 = sshll.u32 %s284_s23, 4  ;;  %s616_s17 = int_to_ptr.vmem [resolvable:$true] %s615_s17 }
 0x1bc   : > { %s764_s9 = scalar_lea.vmem %s616_s17, %s1000_s30  ;;  %s831_s18 = smov [#allocation3]  }
 0x1bd   : > { %p765_p13 = scmp.ne.s32.totalorder %s616_s17, %s764_s9  ;;  %s768_s19 = sshll.u32 %s831_s18, 4  ;;  %s769_s19 = int_to_ptr.vmem [resolvable:$false] %s768_s19 }
 0x1be   : > { %s770_s20 = scalar_lea.vmem %s769_s19, 64  ;;  %p771_p2 = scmp.lt.s32.totalorder %s616_s17, %s769_s19 }
 0x1bf   : > { %p766_p0 = pnand %p765_p13, %p686_p12  ;;  %p772_p3 = scmp.lt.s32.totalorder %s770_s20, %s764_s9 }
 0x1c1   : > { %p767_p1 = pneg %p766_p0  ;;  %p773_p4 = por %p772_p3, %p771_p2 }
 0x1c3   : > { %p774_p5 = pnand %p773_p4, %p767_p1 }
 0x1c5   : > { %777 = shalt.err (!%p774_p5)
}
 0x1c6   : > { %s778_s6 = scalar_lea.hbm %s1009_s12, %s1000_s30  ;;  %s782_s23 = scalar_lea.hbm %s1056_s7, 48 }
 0x1c7   : > { %p779_p7 = scmp.ne.s32.totalorder %s1009_s12, %s778_s6  ;;  %p783_p10 = scmp.lt.u32.totalorder %s1009_s12, %s1056_s7 }
 0x1c8   : > { %p784_p11 = scmp.lt.u32.totalorder %s782_s23, %s778_s6  ;;  %p786_p0 = scmp.lt.u32.totalorder %s778_s6, %s1009_s12 }
 0x1c9   : > { %p780_p8 = pnand %p779_p7, %p686_p12 }
 0x1ca   : > { %p785_p13 = por %p784_p11, %p783_p10 }
 0x1cb   : > { %p781_p9 = pneg %p780_p8 }
 0x1cc   : > { %p787_p1 = por %p786_p0, %p785_p13 }
 0x1ce   : > { %p788_p2 = pnand %p787_p1, %p781_p9 }
 0x1d0   : > { %791 = shalt.err (!%p788_p2)
}
 0x1d1   : > { %618 = dma.vmem_to_hbm [thread:$0]  (%p686_p12), %s616_s17, %s1000_s30, %s1009_s12, %s995_s24  }
 0x1d2 PF: > { %p710_p3 = scmp.ge.s32.totalorder %s826_s29, 2  ;;  %s627_s14 = sand.u32 1, %s814_s26  }
 0x1d3   : > { %s628_s15 = scalar_lea.sflag [#allocation4], %s627_s14 }
 0x1d4   : > { %p707_p4 = pnand %p710_p3, %p917_p6 }
 0x1d6   : > { %809 = dma.done.wait (!%p707_p4), %s628_s15, 32  }
 0x1d7   : > { %811 = vsyncadd (!%p707_p4), %s628_s15, 4294967264  ;;  %p19_p5 = scmp.ge.s32.totalorder %s900_s8, 4   ;;  %s1059_s26 = smov %s818_s27 }
 0x1d8   : > { %s1060_s27 = smov %s822_s28  ;;  %s1061_s28 = smov %s911_s11 }
 0x1d9   : > { %s1062_s29 = smov %s900_s8  ;;  %21 = sbr.rel (!%p19_p5) target bundleno = 6 (0x6), region = 83 }
 0x1e0   :  { %633 = vsyncpa [#allocation4], 1 }
 0x1e1   :  { %635 = vsyncpa [#allocation4 + $0x1], 1 }

</bundles_post_ra>
